<compile_context>
chip_gen: v5e
topology: v5e:2x2
jax: 0.10.0
libtpu: 0.0.40
codegen_flags: <defaults>
</compile_context>

<pallas_src>
import jax
import jax.numpy as jnp
from jax import lax
from jax.experimental import pallas as pl
from jax.experimental.pallas import tpu as pltpu


def _round_up(a, b):
    return ((a + b - 1) // b) * b


def _vmem_capacity_bytes():
    """Per-TensorCore VMEM capacity; conservative 64 MiB fallback (v7x floor)."""
    try:
        info = pltpu.get_tpu_info()
        for attr in ("vmem_capacity_bytes", "vmem_size_bytes", "vmem_bytes"):
            cap = getattr(info, attr, None)
            if cap:
                return int(cap)
    except Exception:
        pass
    return 64 * 1024 * 1024


def _logistic_kernel(x_ref, w_ref, b_ref, out_ref):
    """One batch tile.

    x_ref:   (TN, D)   input tile, native dtype (bf16 hits the MXU natively)
    w_ref:   (C, D)    nn.Linear weight layout (no wrapper transpose)
    b_ref:   (C, 1)    bias
    out_ref: (2*C, TN) f32 slab: rows [0, C) = probs^T, rows [C, 2C) = logits^T.
             Last dim is the batch tile (multiple of 128 lanes) -> lane-dense stores.
    """
    x = x_ref[...]
    w = w_ref[...]
    b = b_ref[...].astype(jnp.float32)

    # logits^T = W @ X^T: contract the shared D axis; MXU, f32 accumulation.
    logits_t = lax.dot_general(
        w, x,
        dimension_numbers=(((1,), (1,)), ((), ())),
        preferred_element_type=jnp.float32,
    ) + b                                              # (C, TN) f32

    # Numerically-stable softmax over the class axis (axis 0 here == PyTorch dim=1).
    m = jnp.max(logits_t, axis=0, keepdims=True)       # (1, TN)
    e = jnp.exp(logits_t - m)
    denom = jnp.sum(e, axis=0, keepdims=True)
    probs_t = e * pl.reciprocal(denom, approx=False)   # exact: sum(probs)==1 to ~1e-6

    # Single stacked, lane-dense store (for C=4 this is a full 8-sublane slab).
    out_ref[...] = jnp.concatenate([probs_t, logits_t], axis=0)


def logistic_regression_forward(x, weight, bias):
    """Forward pass matching the PyTorch module.

    x:      (N, in_dim)
    weight: (n_class, in_dim)   -- nn.Linear layout, NOT pre-transposed
    bias:   (n_class,)

    Returns (softmax_probs, logits) == (out, Theta_x).
    probs are returned in x.dtype; logits stay f32 (MXU accumulation precision).
    """
    N, D = x.shape
    C, D2 = weight.shape
    assert D == D2, "weight must be (n_class, in_dim)"
    b2 = bias.reshape(C, 1)

    x_isz = jnp.dtype(x.dtype).itemsize
    w_isz = jnp.dtype(weight.dtype).itemsize
    b_isz = jnp.dtype(bias.dtype).itemsize

    # --- VMEM-budget-driven batch tile (lane/sublane padding aware) --------------
    Dp = _round_up(D, 128)                 # x tile lane padding
    out_rows = _round_up(2 * C, 8)         # f32 output slab sublane padding
    # Per-batch-row bytes: double-buffered x tile + double-buffered output slab.
    row_bytes = 2 * Dp * x_isz + 2 * out_rows * 4
    # Resident weight + bias (double-buffered by the default pipeline; a few KiB here).
    fixed_bytes = 2 * (_round_up(C, 8) * Dp * w_isz + _round_up(C, 8) * 128 * b_isz)

    cap = _vmem_capacity_bytes()
    # Headroom: ~51 MiB budget on 64 MiB (v7x) parts, ~102 MiB on 128 MiB (v5e/v6e).
    budget = max(min(int(cap * 0.8), cap - (12 << 20)), 16 << 20)

    if N <= 256:
        # Tiny batch: one full-array block (block dims equal to array dims are always
        # legal, and there is not enough work to split across TensorCores anyway).
        TN = N
    else:
        tn_budget = max(128, ((budget - fixed_bytes) // row_bytes) // 128 * 128)
        # Guarantee >= 2 grid steps so ("parallel",) feeds both v7x TensorCores.
        tn_cap = max(128, (N - 1) // 128 * 128)
        TN = min(tn_budget, tn_cap)
        # Prefer an even number of roughly balanced steps.
        nsteps = pl.cdiv(N, TN)
        if nsteps > 1 and nsteps % 2 == 1:
            TN = max(128, _round_up(pl.cdiv(N, nsteps + 1), 128))
    grid = (pl.cdiv(N, TN),)

    vmem_needed = fixed_bytes + row_bytes * TN
    vmem_limit = int(min(max(vmem_needed + (8 << 20), 32 << 20), cap - (4 << 20)))

    out_shape = jax.ShapeDtypeStruct((2 * C, N), jnp.float32)

    in_specs = [
        pl.BlockSpec((TN, D), lambda i: (i, 0)),    # x tile, pipelined over the batch
        pl.BlockSpec((C, D), lambda i: (0, 0)),     # full weight, resident
        pl.BlockSpec((C, 1), lambda i: (0, 0)),     # bias, resident
    ]
    out_specs = pl.BlockSpec((2 * C, TN), lambda i: (0, i))   # lane-dense (batch-major)

    cost = pl.CostEstimate(
        flops=2 * N * D * C,
        transcendentals=N * C,
        bytes_accessed=N * D * x_isz + C * D * w_isz + C * b_isz + 2 * C * N * 4,
    )

    out = pl.pallas_call(
        _logistic_kernel,
        out_shape=out_shape,
        grid=grid,
        in_specs=in_specs,
        out_specs=out_specs,
        compiler_params=pltpu.CompilerParams(
            dimension_semantics=("parallel",),
            vmem_limit_bytes=vmem_limit,
        ),
        cost_estimate=cost,
    )(x, weight, b2)

    probs = out[:C, :].T.astype(x.dtype)
    logits = out[C:, :].T                       # keep f32 (accumulation precision)
    return probs, logits


if __name__ == "__main__":
    in_dim = 32
    n_class = 4
    batch = 8

    key = jax.random.PRNGKey(0)
    kx, kw, kb = jax.random.split(key, 3)

    # Deterministic parameter init mimicking nn.Linear: U(-1/sqrt(in_dim), 1/sqrt(in_dim))
    bound = 1.0 / (in_dim ** 0.5)
    weight = jax.random.uniform(kw, (n_class, in_dim), jnp.float32, -bound, bound)
    bias = jax.random.uniform(kb, (n_class,), jnp.float32, -bound, bound)
    x = jax.random.normal(kx, (batch, in_dim), jnp.float32)

    probs, logits = logistic_regression_forward(x, weight, bias)
    jax.block_until_ready((probs, logits))

    # Sanity check against plain-JAX reference (single-block path).
    ref_logits = x @ weight.T + bias
    ref_probs = jax.nn.softmax(ref_logits, axis=1)
    assert probs.shape == (batch, n_class) and logits.shape == (batch, n_class)
    assert jnp.allclose(logits, ref_logits, atol=1e-5)
    assert jnp.allclose(probs, ref_probs, atol=1e-5)
    assert jnp.allclose(jnp.sum(probs, axis=1), 1.0, atol=1e-5)

    # Exercise the tiled, multi-step (ragged last block) path as well.
    x2 = jax.random.normal(kx, (1000, in_dim), jnp.float32)
    probs2, logits2 = logistic_regression_forward(x2, weight, bias)
    jax.block_until_ready((probs2, logits2))
    ref_logits2 = x2 @ weight.T + bias
    ref_probs2 = jax.nn.softmax(ref_logits2, axis=1)
    assert jnp.allclose(logits2, ref_logits2, atol=1e-5)
    assert jnp.allclose(probs2, ref_probs2, atol=1e-5)
    assert jnp.allclose(jnp.sum(probs2, axis=1), 1.0, atol=1e-5)

    print("KERNEL_OK")
</pallas_src>

<mosaic_0001>
module attributes {stable_mosaic.version = 11 : i64} {
  func.func @_logistic_kernel(%arg0: i32, %arg1: memref<8x32xf32, #tpu.memory_space<vmem>>, %arg2: memref<4x32xf32, #tpu.memory_space<vmem>>, %arg3: memref<4x1xf32, #tpu.memory_space<vmem>>, %arg4: memref<8x8xf32, #tpu.memory_space<vmem>>) attributes {dimension_semantics = [#tpu.dimension_semantics<parallel>], iteration_bounds = array<i64: 1>, scalar_prefetch = 0 : i64, scratch_operands = 0 : i64, tpu.core_type = #tpu.core_type<tc>, window_params = [{transform_indices = @transform_0, window_bounds = array<i64: 8, 32>}, {pipeline_mode = #tpu.pipeline_mode<synchronous>, transform_indices = @transform_1, window_bounds = array<i64: 4, 32>}, {pipeline_mode = #tpu.pipeline_mode<synchronous>, transform_indices = @transform_2, window_bounds = array<i64: 4, 1>}, {transform_indices = @transform_3, window_bounds = array<i64: 8, 8>}]} {
    %c0 = arith.constant 0 : index
    %c0_0 = arith.constant 0 : index
    %0 = vector.load %arg1[%c0, %c0_0] : memref<8x32xf32, #tpu.memory_space<vmem>>, vector<8x32xf32>
    %c0_1 = arith.constant 0 : index
    %c0_2 = arith.constant 0 : index
    %1 = vector.load %arg2[%c0_1, %c0_2] : memref<4x32xf32, #tpu.memory_space<vmem>>, vector<4x32xf32>
    %c0_3 = arith.constant 0 : index
    %c0_4 = arith.constant 0 : index
    %2 = vector.load %arg3[%c0_3, %c0_4] : memref<4x1xf32, #tpu.memory_space<vmem>>, vector<4x1xf32>
    %cst = arith.constant dense<0.000000e+00> : vector<4x8xf32>
    %3 = tpu.matmul %1, %0, %cst {dimension_numbers = #tpu.dot_dimension_numbers<[1], [1], [0], [0], [0, 0, 1, 0], [], []>} : vector<4x32xf32>, vector<8x32xf32>, vector<4x8xf32> -> vector<4x8xf32>
    %4 = vector.broadcast %2 : vector<4x1xf32> to vector<4x8xf32>
    %5 = arith.addf %3, %4 : vector<4x8xf32>
    %cst_5 = arith.constant dense<0xFF800000> : vector<8xf32>
    %6 = vector.multi_reduction <maximumf>, %5, %cst_5 [0] : vector<4x8xf32> to vector<8xf32>
    %7 = vector.shape_cast %6 : vector<8xf32> to vector<1x8xf32>
    %8 = vector.broadcast %7 : vector<1x8xf32> to vector<4x8xf32>
    %9 = arith.subf %5, %8 : vector<4x8xf32>
    %10 = math.exp %9 : vector<4x8xf32>
    %cst_6 = arith.constant dense<0.000000e+00> : vector<8xf32>
    %11 = vector.multi_reduction <add>, %10, %cst_6 [0] : vector<4x8xf32> to vector<8xf32>
    %12 = vector.shape_cast %11 : vector<8xf32> to vector<1x8xf32>
    %13 = tpu.reciprocal %12 : vector<1x8xf32> -> vector<1x8xf32>
    %14 = vector.broadcast %13 : vector<1x8xf32> to vector<4x8xf32>
    %15 = arith.mulf %10, %14 : vector<4x8xf32>
    %16 = tpu.concatenate %15, %5 in 0 : vector<4x8xf32>, vector<4x8xf32> -> vector<8x8xf32>
    %c0_7 = arith.constant 0 : index
    %c0_8 = arith.constant 0 : index
    %17 = vector.load %arg4[%c0_7, %c0_8] : memref<8x8xf32, #tpu.memory_space<vmem>>, vector<8x8xf32>
    tpu.vector_store %arg4[%c0_7, %c0_8], %16 {strides = array<i32>} : memref<8x8xf32, #tpu.memory_space<vmem>>, vector<8x8xf32>,
    return
  }
  func.func @transform_0(%arg0: i32) -> (i32, i32) {
    %c0_i32 = arith.constant 0 : i32
    %c0_i32_0 = arith.constant 0 : i32
    return %arg0, %c0_i32 : i32, i32
  }
  func.func @transform_1(%arg0: i32) -> (i32, i32) {
    %c0_i32 = arith.constant 0 : i32
    %c0_i32_0 = arith.constant 0 : i32
    %c0_i32_1 = arith.constant 0 : i32
    return %c0_i32, %c0_i32_0 : i32, i32
  }
  func.func @transform_2(%arg0: i32) -> (i32, i32) {
    %c0_i32 = arith.constant 0 : i32
    %c0_i32_0 = arith.constant 0 : i32
    %c0_i32_1 = arith.constant 0 : i32
    return %c0_i32, %c0_i32_0 : i32, i32
  }
  func.func @transform_3(%arg0: i32) -> (i32, i32) {
    %c0_i32 = arith.constant 0 : i32
    %c0_i32_0 = arith.constant 0 : i32
    return %c0_i32, %arg0 : i32, i32
  }
}

</mosaic_0001>

<bundles_post_ra>
// kernel: tpu_custom_call.1
= control target key start
LH: loop header
LB: loop body
LE: loop exit
PB: predicated region body
PF: predicated region fallthrough
CT: control target
= control target key end

     0   :  { %8 = vsyncpa [#allocation3], 0  ;;  %s218_s0 = inlined_call_operand.hbm [shape: f32[8,32], index: 0, kind: input, shape index: {}]   ;;  %s219_s1 = inlined_call_operand.vmem [shape: f32[4,32], index: 1, kind: input, shape index: {}]   ;;  %s220_s2 = inlined_call_operand.vmem [shape: f32[4,1], index: 2, kind: input, shape index: {}]   ;;  %s221_s3 = inlined_call_operand.hbm [shape: f32[8,8], index: 3, kind: output, shape index: {}]  }
   0x1   :  { %9 = vsyncpa [#allocation4], 0  ;;  %s15_s14 = sshll.u32 %s218_s0, 4  ;;  %s183_s15 = smov [#allocation2]   ;;  %s16_s14 = int_to_ptr.hbm [resolvable:$true] %s15_s14 }
   0x2   :  { %s17_s16 = sshll.u32 %s183_s15, 4  ;;  %s18_s16 = int_to_ptr.vmem [resolvable:$true] %s17_s16 }
   0x3   :  { %20 = dma.hbm_to_vmem [thread:$0]  %s16_s14, 128, %s18_s16, [#allocation3]  }
   0x4   :  { %179 = dma.done.wait [#allocation3], 128  }
   0x5   :  { %180 = vsyncadd [#allocation3], 4294967168  ;;  %v184_v0 = vmov 0   ;;  %vm37_vm0 = vcmask 261120   ;;  %v29_v1 = vld [vmem:[#allocation2] sm:$0xff]  ;;  %vm64_vm1 = vcmask 60416  }
   0x6   :  { %126 = vset.pattern.permute.xlu0 %v184_v0  ;;  %v31_v2 = vld [vmem:[%s220_s2] sm:$0xf]  ;;  %121 = vmatpush.xpose.msk.msra.mxu0 %vm37_vm0, %v29_v1  ;;  %s185_s0 = smov [#allocation5]   ;;  %s111_s22 = sshll.u32 %s221_s3, 4  ;;  %vm100_vm6 = vcmask 1043456   ;;  %vm102_vm7 = vcmask 64512   ;;  %s112_s22 = int_to_ptr.hbm [resolvable:$true] %s111_s22 }
   0x7   :  { %v30_v3 = vld [vmem:[%s219_s1] sm:$0xf]  ;;  %34 = vperm.xlu0 %126, %v31_v2   ;;  %s109_s1 = sshll.u32 %s185_s0, 4  ;;  %s110_s1 = int_to_ptr.vmem [resolvable:$true] %s109_s1 }
   0x9   :  { %122 = vmatmul.msk.f32.vlgmr.msra.gmra.mxu0 %vm37_vm0, %v30_v3 }
  0x79   :  { %v35_v4 = vpop.permute.xlu0 %34 }
  0x86   :  { %v61_v5 = vpop.f32.mrf.mxu0 }
  0x87   :  { %v62_v6 = vadd.f32 %v61_v5, %v35_v4 }
  0x89   :  { %v65_v7 = vsel %vm64_vm1, %v62_v6, -inf  ;;  %v98_v34 = vrot.slane %v62_v6, 4 }
  0x8a   :  { %v66_v8 = vrot.slane %v65_v7, 4 }
  0x8c   :  { %v67_v9 = vmax.f32 %v65_v7, %v66_v8 }
  0x8e   :  { %v68_v10 = vrot.slane %v67_v9, 2 }
  0x90   :  { %v69_v11 = vmax.f32 %v67_v9, %v68_v10 }
  0x92   :  { %v70_v12 = vrot.slane %v69_v11, 1 }
  0x94   :  { %v71_v13 = vmax.f32 %v69_v11, %v70_v12 }
  0x96   :  { %v72_v14 = vsub.f32 %v62_v6, %v71_v13 }
  0x98   :  { %v73_v15 = vmul.f32 1.442695, %v72_v14 }
  0x9a   :  { %127 = vpow2.f32 %v73_v15 }
  0xa0   :  { %v128_v16 = vpop.eup %127 }
  0xa1   :  { %v75_v17 = vsel %vm64_vm1, %v128_v16, 0.0 }
  0xa2   :  { %v76_v18 = vrot.slane %v75_v17, 4 }
  0xa4   :  { %v77_v19 = vadd.f32 %v76_v18, %v75_v17 }
  0xa6   :  { %v78_v20 = vrot.slane %v77_v19, 2 }
  0xa8   :  { %v79_v21 = vadd.f32 %v78_v20, %v77_v19 }
  0xaa   :  { %v80_v22 = vrot.slane %v79_v21, 1 }
  0xac   :  { %v81_v23 = vadd.f32 %v80_v22, %v79_v21 }
  0xae   :  { %129 = vrcp.f32 %v81_v23  ;;  %v93_v27 = vand.u32 2147483648, %v81_v23  ;;  %v91_v29 = vand.u32 2147483647, %v81_v23  ;;  %vm87_vm3 = vweird.f32 %v81_v23 }
  0xb0   :  { %v94_v31 = vor.u32 1.1754944e-38, %v93_v27  ;;  %vm92_vm5 = vcmp.eq.f32.partialorder %v91_v29, 8.507059e+37 }
  0xb4   :  { %v130_v24 = vpop.eup %129 }
  0xb5   :  { %v83_v25 = vmul.f32 %v130_v24, %v81_v23  ;;  %vm88_vm2 = vweird.f32 %v130_v24 }
  0xb6   :  { %vm89_vm4 = vmor %vm87_vm3, %vm88_vm2 }
  0xb7   :  { %v84_v26 = vsub.f32 1.0, %v83_v25 }
  0xb9   :  { %v85_v28 = vmul.f32 %v130_v24, %v84_v26 }
  0xbb   :  { %v86_v30 = vadd.f32 %v130_v24, %v85_v28 }
  0xbd   :  { %v90_v32 = vsel %vm89_vm4, %v130_v24, %v86_v30 }
  0xbe   :  { %v95_v33 = vsel %vm92_vm5, %v94_v31, %v90_v32 }
  0xbf   :  { %v96_v35 = vmul.f32 %v128_v16, %v95_v33 }
  0xc1   :  { %v101_v36 = vsel %vm100_vm6, %v96_v35, %v98_v34 }
  0xc2   :  { %103 = vst.msk [vmem:[#allocation5] sm:$0xff] %vm102_vm7, %v101_v36 }
  0xc3   :  { %114 = dma.vmem_to_hbm [thread:$0]  %s110_s1, 128, %s112_s22, [#allocation4]  }
  0xc4   :  { %181 = dma.done.wait [#allocation4], 128  }
  0xc5   :  { %182 = vsyncadd [#allocation4], 4294967168 }
  0xc6   :  { %119 = vsyncpa [#allocation3], 1 }
  0xc7   :  { %120 = vsyncpa [#allocation4], 1 }

</bundles_post_ra>
